<compile_context>
chip_gen: v7x
topology: tpu7x:2x2x1
jax: 0.10.0
libtpu: 0.0.40
codegen_flags: <defaults>
</compile_context>

<pallas_src>
import functools

import jax
import jax.numpy as jnp
from jax.experimental import pallas as pl
from jax.experimental.pallas import tpu as pltpu

LANE = 128


def _round_up(x, m):
    return (x + m - 1) // m * m


def _pad2(arr, rows, cols, dtype):
    """Zero-pad a 2-D array up to (rows, cols) in the target dtype."""
    out = jnp.zeros((rows, cols), dtype)
    return out.at[:arr.shape[0], :arr.shape[1]].set(arr.astype(dtype))


def _largest_tile(total, cap):
    """Largest tile size <= cap that divides total (total is a multiple of 128)."""
    for cand in (4096, 2048, 1024, 512, 256, 128):
        if cand <= cap and total % cand == 0:
            return cand
    return total


# ---------------------------------------------------------------------------
# One GINConv block:  out = MLP( A' @ h ),  A' = A + I  (self term folded in).
# Grid = (row tiles [parallel], K reduction tiles [arbitrary, last]).
# ---------------------------------------------------------------------------
def _gin_block_kernel(a_ref, h_ref, w1_ref, b1_ref, w2_ref, b2_ref,
                      out_ref, acc_ref, *, blk_k, final_relu):
    k = pl.program_id(1)

    @pl.when(k == 0)
    def _():
        acc_ref[...] = jnp.zeros_like(acc_ref)

    # Neighbor + self aggregation: acc[i-tile] += A'[i-tile, k-tile] @ h[k-tile].
    # h is resident in VMEM (constant index_map); slice the k-tile in-kernel.
    # bf16 operands on the MXU, f32 accumulation.
    hk = h_ref[pl.ds(pl.multiple_of(k * blk_k, blk_k), blk_k), :]
    acc_ref[...] += jnp.dot(a_ref[...], hk, preferred_element_type=jnp.float32)

    @pl.when(k == pl.num_programs(1) - 1)
    def _():
        # MLP epilogue: bf16 MXU operands, f32 accumulation, f32 biases.
        s = acc_ref[...].astype(jnp.bfloat16)
        hid = jnp.maximum(
            jnp.dot(s, w1_ref[...], preferred_element_type=jnp.float32)
            + b1_ref[...], 0.0)                                   # Linear -> ReLU
        y = (jnp.dot(hid.astype(jnp.bfloat16), w2_ref[...],
                     preferred_element_type=jnp.float32) + b2_ref[...])
        if final_relu:                                            # outer ReLU
            y = jnp.maximum(y, 0.0)
        out_ref[...] = y.astype(out_ref.dtype)


def _gin_block(adj, h, w1, b1, w2, b2, *, blk_i, blk_k, final_relu, out_dtype):
    """adj: (Np, Np) bf16 (= A + I), h: (Np, Cp) bf16. Returns (Np, out_w) out_dtype."""
    np_, cp = h.shape
    out_w = w2.shape[1]
    grid = (np_ // blk_i, np_ // blk_k)

    out_itemsize = jnp.dtype(out_dtype).itemsize
    flops = (2 * np_ * np_ * cp                       # A' @ h
             + 2 * np_ * w1.shape[0] * w1.shape[1]    # layer 1
             + 2 * np_ * w2.shape[0] * w2.shape[1])   # layer 2
    bytes_accessed = (np_ * np_ * 2                   # adjacency (bf16), read once
                      + np_ * cp * 2                  # resident h (bf16), read once
                      + 2 * (w1.size + w2.size)       # bf16 weights
                      + 4 * (b1.size + b2.size)       # f32 biases
                      + np_ * out_w * out_itemsize)   # output

    # VMEM budget (conservatively count 2 buffers per input stream) -> explicit
    # limit, capped at 48 MiB so the pipeline stays double-buffered on v7x.
    vmem_bytes = (2 * blk_i * blk_k * 2               # A' tile, double-buffered
                  + 2 * np_ * cp * 2                  # resident h
                  + 2 * 2 * (w1.size + w2.size)
                  + 2 * 4 * (b1.size + b2.size)
                  + 2 * blk_i * out_w * out_itemsize  # output block
                  + blk_i * cp * 4)                   # f32 accumulator scratch
    vmem_limit = int(min(max(vmem_bytes + (8 << 20), 32 << 20), 48 << 20))

    kernel = functools.partial(_gin_block_kernel, blk_k=blk_k,
                               final_relu=final_relu)

    return pl.pallas_call(
        kernel,
        out_shape=jax.ShapeDtypeStruct((np_, out_w), out_dtype),
        grid_spec=pltpu.PrefetchScalarGridSpec(
            num_scalar_prefetch=0,
            grid=grid,
            in_specs=[
                pl.BlockSpec((blk_i, blk_k), lambda i, k: (i, k)),   # A' tile
                pl.BlockSpec((np_, cp), lambda i, k: (0, 0)),        # resident h
                pl.BlockSpec(w1.shape, lambda i, k: (0, 0)),
                pl.BlockSpec(b1.shape, lambda i, k: (0, 0)),
                pl.BlockSpec(w2.shape, lambda i, k: (0, 0)),
                pl.BlockSpec(b2.shape, lambda i, k: (0, 0)),
            ],
            out_specs=pl.BlockSpec((blk_i, out_w), lambda i, k: (i, 0)),
            scratch_shapes=[pltpu.VMEM((blk_i, cp), jnp.float32)],
        ),
        compiler_params=pltpu.CompilerParams(
            dimension_semantics=("parallel", "arbitrary"),
            vmem_limit_bytes=vmem_limit),
        cost_estimate=pl.CostEstimate(flops=flops, transcendentals=0,
                                      bytes_accessed=bytes_accessed),
    )(adj, h, w1, b1, w2, b2)


# ---------------------------------------------------------------------------
# Full GINEncoder forward.
# ---------------------------------------------------------------------------
def gin_encoder_forward(x, edge_index, params):
    """x: (N, C_in) f32, edge_index: (2, E) int32 (src, dst). Returns (mu, logstd)."""
    n, c_in = x.shape
    hidden = params["w11"].shape[1]
    c_out = params["w12"].shape[1]

    np_ = _round_up(n, LANE)
    cp_in = _round_up(c_in, LANE)     # 128
    hp = _round_up(hidden, LANE)      # 128
    op = _round_up(c_out, LANE)       # 128

    # Tile sizes: long reduction tiles for DMA efficiency; keep >= 2 row tiles
    # when the graph allows so v7x's second TensorCore gets work.
    blk_k = _largest_tile(np_, 4096)
    blk_i = 128 if np_ <= 256 else _largest_tile(np_, 256)

    # Dense adjacency with the GIN self term folded in (eps=0 -> A' = A + I),
    # built directly in bf16 (edge multiplicities <= 256 are exact in bf16).
    # TODO(synk): for large sparse graphs switch to CSR + scalar-prefetch gather
    # instead of the O(N^2) dense adjacency (especially on v5e); for graphs
    # where A' fits in VMEM the two _gin_block calls could also be fused into a
    # single pallas_call keeping A' resident (halves adjacency traffic).
    src, dst = edge_index[0], edge_index[1]
    diag = jnp.arange(n)
    adj = (jnp.zeros((np_, np_), jnp.bfloat16)
           .at[dst, src].add(1.0)
           .at[diag, diag].add(1.0))

    # Aggregation operand already in bf16 (cast once here).
    x_p = _pad2(x, np_, cp_in, jnp.bfloat16)

    # conv1 weights: bf16 matmul operands, f32 biases, lane-dense padded.
    w11 = _pad2(params["w11"], cp_in, hp, jnp.bfloat16)
    b11 = _pad2(params["b11"], 1, hp, jnp.float32)
    w12 = _pad2(params["w12"], hp, op, jnp.bfloat16)
    b12 = _pad2(params["b12"], 1, op, jnp.float32)

    # mu/logstd heads fused: layer-1 weights side-by-side, layer-2 block-diag,
    # producing one packed lane-dense (np_, 2*op) output.
    w_h1 = jnp.concatenate([_pad2(params["w21"], op, hp, jnp.bfloat16),
                            _pad2(params["w31"], op, hp, jnp.bfloat16)], axis=1)
    b_h1 = jnp.concatenate([_pad2(params["b21"], 1, hp, jnp.float32),
                            _pad2(params["b31"], 1, hp, jnp.float32)], axis=1)
    w_h2 = jnp.zeros((2 * hp, 2 * op), jnp.bfloat16)
    w_h2 = w_h2.at[:hp, :op].set(_pad2(params["w22"], hp, op, jnp.bfloat16))
    w_h2 = w_h2.at[hp:, op:].set(_pad2(params["w32"], hp, op, jnp.bfloat16))
    b_h2 = jnp.concatenate([_pad2(params["b22"], 1, op, jnp.float32),
                            _pad2(params["b32"], 1, op, jnp.float32)], axis=1)

    # conv1 (+ the outer ReLU fused); bf16 output feeds block 2's aggregation.
    x1 = _gin_block(adj, x_p, w11, b11, w12, b12, blk_i=blk_i, blk_k=blk_k,
                    final_relu=True, out_dtype=jnp.bfloat16)

    # conv_mu / conv_logstd: ONE shared aggregation A'@x1, one packed wide MLP,
    # single lane-dense (np_, 256) f32 output.
    packed = _gin_block(adj, x1, w_h1, b_h1, w_h2, b_h2, blk_i=blk_i,
                        blk_k=blk_k, final_relu=False, out_dtype=jnp.float32)

    mu = packed[:n, :c_out]
    logstd = packed[:n, op:op + c_out]
    return mu, logstd


# ---------------------------------------------------------------------------
# Params / reference
# ---------------------------------------------------------------------------
def init_params(key, in_channels, out_channels):
    """Deterministic synthetic init matching the nn.Linear shapes in __init__."""
    hidden = 2 * out_channels

    def linear(k, fan_in, fan_out):
        kw, kb = jax.random.split(k)
        bound = 1.0 / jnp.sqrt(fan_in)
        w = jax.random.uniform(kw, (fan_in, fan_out), jnp.float32, -bound, bound)
        b = jax.random.uniform(kb, (1, fan_out), jnp.float32, -bound, bound)
        return w, b

    keys = jax.random.split(key, 6)
    p = {}
    p["w11"], p["b11"] = linear(keys[0], in_channels, hidden)
    p["w12"], p["b12"] = linear(keys[1], hidden, out_channels)
    p["w21"], p["b21"] = linear(keys[2], out_channels, hidden)
    p["w22"], p["b22"] = linear(keys[3], hidden, out_channels)
    p["w31"], p["b31"] = linear(keys[4], out_channels, hidden)
    p["w32"], p["b32"] = linear(keys[5], hidden, out_channels)
    return p


def _reference(x, edge_index, params):
    """Pure-JAX f32 reference of the same forward pass."""
    n = x.shape[0]
    adj = jnp.zeros((n, n), jnp.float32).at[edge_index[1], edge_index[0]].add(1.0)

    def gin(h, w1, b1, w2, b2):
        s = h + adj @ h
        return jnp.maximum(s @ w1 + b1, 0.0) @ w2 + b2

    x1 = jnp.maximum(gin(x, params["w11"], params["b11"],
                         params["w12"], params["b12"]), 0.0)
    mu = gin(x1, params["w21"], params["b21"], params["w22"], params["b22"])
    ls = gin(x1, params["w31"], params["b31"], params["w32"], params["b32"])
    return mu, ls


if __name__ == "__main__":
    key = jax.random.PRNGKey(0)
    k_x, k_e, k_p = jax.random.split(key, 3)

    N = 16            # nodes
    E = 40            # edges
    IN_CHANNELS = 8
    OUT_CHANNELS = 16

    x = jax.random.normal(k_x, (N, IN_CHANNELS), jnp.float32)
    edge_index = jax.random.randint(k_e, (2, E), 0, N, jnp.int32)
    params = init_params(k_p, IN_CHANNELS, OUT_CHANNELS)

    mu, logstd = gin_encoder_forward(x, edge_index, params)
    jax.block_until_ready((mu, logstd))

    mu_ref, logstd_ref = _reference(x, edge_index, params)
    assert mu.shape == (N, OUT_CHANNELS) and logstd.shape == (N, OUT_CHANNELS)
    # Aggregation and both MLP layers run on the bf16 MXU path (f32 accumulation),
    # so accuracy is bf16-level end-to-end vs the full-f32 reference.
    assert jnp.allclose(mu, mu_ref, atol=5e-2, rtol=5e-2)
    assert jnp.allclose(logstd, logstd_ref, atol=5e-2, rtol=5e-2)

    print("KERNEL_OK")
</pallas_src>

<mosaic_0001>
module attributes {stable_mosaic.version = 11 : i64} {
  func.func @_gin_block_kernel(%arg0: i32, %arg1: i32, %arg2: memref<128x128xbf16, #tpu.memory_space<vmem>>, %arg3: memref<128x128xbf16, #tpu.memory_space<vmem>>, %arg4: memref<128x128xbf16, #tpu.memory_space<vmem>>, %arg5: memref<1x128xf32, #tpu.memory_space<vmem>>, %arg6: memref<128x128xbf16, #tpu.memory_space<vmem>>, %arg7: memref<1x128xf32, #tpu.memory_space<vmem>>, %arg8: memref<128x128xbf16, #tpu.memory_space<vmem>>, %arg9: memref<128x128xf32, #tpu.memory_space<vmem>>) attributes {dimension_semantics = [#tpu.dimension_semantics<parallel>, #tpu.dimension_semantics<arbitrary>], iteration_bounds = array<i64: 1, 1>, scalar_prefetch = 0 : i64, scratch_operands = 1 : i64, tpu.core_type = #tpu.core_type<tc>, window_params = [{transform_indices = @transform_0, window_bounds = array<i64: 128, 128>}, {pipeline_mode = #tpu.pipeline_mode<synchronous>, transform_indices = @transform_1, window_bounds = array<i64: 128, 128>}, {pipeline_mode = #tpu.pipeline_mode<synchronous>, transform_indices = @transform_2, window_bounds = array<i64: 128, 128>}, {pipeline_mode = #tpu.pipeline_mode<synchronous>, transform_indices = @transform_3, window_bounds = array<i64: 1, 128>}, {pipeline_mode = #tpu.pipeline_mode<synchronous>, transform_indices = @transform_4, window_bounds = array<i64: 128, 128>}, {pipeline_mode = #tpu.pipeline_mode<synchronous>, transform_indices = @transform_5, window_bounds = array<i64: 1, 128>}, {transform_indices = @transform_6, window_bounds = array<i64: 128, 128>}]} {
    %c0_i32 = arith.constant 0 : i32
    %0 = arith.cmpi eq, %arg1, %c0_i32 : i32
    %1 = arith.extui %0 : i1 to i32
    %c0_i32_0 = arith.constant 0 : i32
    %2 = arith.cmpi ne, %1, %c0_i32_0 : i32
    scf.if %2 {
      %cst_9 = arith.constant 0.000000e+00 : f32
      %15 = vector.broadcast %cst_9 : f32 to vector<128x128xf32>
      %c0_10 = arith.constant 0 : index
      %c0_11 = arith.constant 0 : index
      %16 = vector.load %arg9[%c0_10, %c0_11] : memref<128x128xf32, #tpu.memory_space<vmem>>, vector<128x128xf32>
      tpu.vector_store %arg9[%c0_10, %c0_11], %15 {strides = array<i32>} : memref<128x128xf32, #tpu.memory_space<vmem>>, vector<128x128xf32>,
    } else {
    }
    %c128_i32 = arith.constant 128 : i32
    %3 = arith.muli %arg1, %c128_i32 : i32
    %4 = tpu.assume_multiple %3, 128 : i32
    %5 = arith.index_cast %4 : i32 to index
    %c0 = arith.constant 0 : index
    %6 = vector.load %arg3[%5, %c0] : memref<128x128xbf16, #tpu.memory_space<vmem>>, vector<128x128xbf16>
    %c0_1 = arith.constant 0 : index
    %c0_2 = arith.constant 0 : index
    %7 = vector.load %arg9[%c0_1, %c0_2] : memref<128x128xf32, #tpu.memory_space<vmem>>, vector<128x128xf32>
    %c0_3 = arith.constant 0 : index
    %c0_4 = arith.constant 0 : index
    %8 = vector.load %arg2[%c0_3, %c0_4] : memref<128x128xbf16, #tpu.memory_space<vmem>>, vector<128x128xbf16>
    %cst = arith.constant dense<0.000000e+00> : vector<128x128xf32>
    %9 = tpu.matmul %8, %6, %cst {dimension_numbers = #tpu.dot_dimension_numbers<[1], [0], [0], [1], [0, 0, 1, 1], [], []>} : vector<128x128xbf16>, vector<128x128xbf16>, vector<128x128xf32> -> vector<128x128xf32>
    %10 = arith.addf %7, %9 : vector<128x128xf32>
    %c0_5 = arith.constant 0 : index
    %c0_6 = arith.constant 0 : index
    %11 = vector.load %arg9[%c0_5, %c0_6] : memref<128x128xf32, #tpu.memory_space<vmem>>, vector<128x128xf32>
    tpu.vector_store %arg9[%c0_5, %c0_6], %10 {strides = array<i32>} : memref<128x128xf32, #tpu.memory_space<vmem>>, vector<128x128xf32>,
    %c0_i32_7 = arith.constant 0 : i32
    %12 = arith.cmpi eq, %arg1, %c0_i32_7 : i32
    %13 = arith.extui %12 : i1 to i32
    %c0_i32_8 = arith.constant 0 : i32
    %14 = arith.cmpi ne, %13, %c0_i32_8 : i32
    scf.if %14 {
      %c0_9 = arith.constant 0 : index
      %c0_10 = arith.constant 0 : index
      %15 = vector.load %arg9[%c0_9, %c0_10] : memref<128x128xf32, #tpu.memory_space<vmem>>, vector<128x128xf32>
      %16 = arith.truncf %15 : vector<128x128xf32> to vector<128x128xbf16>
      %c0_11 = arith.constant 0 : index
      %c0_12 = arith.constant 0 : index
      %17 = vector.load %arg4[%c0_11, %c0_12] : memref<128x128xbf16, #tpu.memory_space<vmem>>, vector<128x128xbf16>
      %cst_13 = arith.constant dense<0.000000e+00> : vector<128x128xf32>
      %18 = tpu.matmul %16, %17, %cst_13 {dimension_numbers = #tpu.dot_dimension_numbers<[1], [0], [0], [1], [0, 0, 1, 1], [], []>} : vector<128x128xbf16>, vector<128x128xbf16>, vector<128x128xf32> -> vector<128x128xf32>
      %c0_14 = arith.constant 0 : index
      %c0_15 = arith.constant 0 : index
      %19 = vector.load %arg5[%c0_14, %c0_15] : memref<1x128xf32, #tpu.memory_space<vmem>>, vector<1x128xf32>
      %20 = vector.broadcast %19 : vector<1x128xf32> to vector<128x128xf32>
      %21 = arith.addf %18, %20 : vector<128x128xf32>
      %cst_16 = arith.constant 0.000000e+00 : f32
      %22 = vector.broadcast %cst_16 : f32 to vector<128x128xf32>
      %23 = arith.maximumf %21, %22 : vector<128x128xf32>
      %24 = arith.truncf %23 : vector<128x128xf32> to vector<128x128xbf16>
      %c0_17 = arith.constant 0 : index
      %c0_18 = arith.constant 0 : index
      %25 = vector.load %arg6[%c0_17, %c0_18] : memref<128x128xbf16, #tpu.memory_space<vmem>>, vector<128x128xbf16>
      %cst_19 = arith.constant dense<0.000000e+00> : vector<128x128xf32>
      %26 = tpu.matmul %24, %25, %cst_19 {dimension_numbers = #tpu.dot_dimension_numbers<[1], [0], [0], [1], [0, 0, 1, 1], [], []>} : vector<128x128xbf16>, vector<128x128xbf16>, vector<128x128xf32> -> vector<128x128xf32>
      %c0_20 = arith.constant 0 : index
      %c0_21 = arith.constant 0 : index
      %27 = vector.load %arg7[%c0_20, %c0_21] : memref<1x128xf32, #tpu.memory_space<vmem>>, vector<1x128xf32>
      %28 = vector.broadcast %27 : vector<1x128xf32> to vector<128x128xf32>
      %29 = arith.addf %26, %28 : vector<128x128xf32>
      %cst_22 = arith.constant 0.000000e+00 : f32
      %30 = vector.broadcast %cst_22 : f32 to vector<128x128xf32>
      %31 = arith.maximumf %29, %30 : vector<128x128xf32>
      %32 = arith.truncf %31 : vector<128x128xf32> to vector<128x128xbf16>
      %c0_23 = arith.constant 0 : index
      %c0_24 = arith.constant 0 : index
      %33 = vector.load %arg8[%c0_23, %c0_24] : memref<128x128xbf16, #tpu.memory_space<vmem>>, vector<128x128xbf16>
      tpu.vector_store %arg8[%c0_23, %c0_24], %32 {strides = array<i32>} : memref<128x128xbf16, #tpu.memory_space<vmem>>, vector<128x128xbf16>,
    } else {
    }
    return
  }
  func.func @transform_0(%arg0: i32, %arg1: i32) -> (i32, i32) {
    %c0_i32 = arith.constant 0 : i32
    return %arg0, %arg1 : i32, i32
  }
  func.func @transform_1(%arg0: i32, %arg1: i32) -> (i32, i32) {
    %c0_i32 = arith.constant 0 : i32
    %c0_i32_0 = arith.constant 0 : i32
    %c0_i32_1 = arith.constant 0 : i32
    return %c0_i32, %c0_i32_0 : i32, i32
  }
  func.func @transform_2(%arg0: i32, %arg1: i32) -> (i32, i32) {
    %c0_i32 = arith.constant 0 : i32
    %c0_i32_0 = arith.constant 0 : i32
    %c0_i32_1 = arith.constant 0 : i32
    return %c0_i32, %c0_i32_0 : i32, i32
  }
  func.func @transform_3(%arg0: i32, %arg1: i32) -> (i32, i32) {
    %c0_i32 = arith.constant 0 : i32
    %c0_i32_0 = arith.constant 0 : i32
    %c0_i32_1 = arith.constant 0 : i32
    return %c0_i32, %c0_i32_0 : i32, i32
  }
  func.func @transform_4(%arg0: i32, %arg1: i32) -> (i32, i32) {
    %c0_i32 = arith.constant 0 : i32
    %c0_i32_0 = arith.constant 0 : i32
    %c0_i32_1 = arith.constant 0 : i32
    return %c0_i32, %c0_i32_0 : i32, i32
  }
  func.func @transform_5(%arg0: i32, %arg1: i32) -> (i32, i32) {
    %c0_i32 = arith.constant 0 : i32
    %c0_i32_0 = arith.constant 0 : i32
    %c0_i32_1 = arith.constant 0 : i32
    return %c0_i32, %c0_i32_0 : i32, i32
  }
  func.func @transform_6(%arg0: i32, %arg1: i32) -> (i32, i32) {
    %c0_i32 = arith.constant 0 : i32
    %c0_i32_0 = arith.constant 0 : i32
    return %arg0, %c0_i32 : i32, i32
  }
}

</mosaic_0001>

<bundles_post_ra>
// kernel: tpu_custom_call.1
= control target key start
LH: loop header
LB: loop body
LE: loop exit
PB: predicated region body
PF: predicated region fallthrough
CT: control target
= control target key end

     0   :  { %11 = vsyncpa [#allocation4], 0  ;;  %s1449_s0 = inlined_call_operand.hbm [shape: bf16[128,128], index: 0, kind: input, shape index: {}]   ;;  %s1450_s1 = inlined_call_operand.hbm [shape: bf16[128,128], index: 1, kind: input, shape index: {}]   ;;  %s1451_s2 = inlined_call_operand.hbm [shape: bf16[128,128], index: 2, kind: input, shape index: {}]   ;;  %s1452_s3 = inlined_call_operand.vmem [shape: f32[1,128], index: 3, kind: input, shape index: {}]   ;;  %s1453_s4 = inlined_call_operand.hbm [shape: bf16[128,128], index: 4, kind: input, shape index: {}]   ;;  %s1454_s5 = inlined_call_operand.vmem [shape: f32[1,128], index: 5, kind: input, shape index: {}]   ;;  %s1455_s6 = inlined_call_operand.hbm [shape: bf16[128,128], index: 6, kind: output, shape index: {}]  }
   0x1   :  { %12 = vsyncpa [#allocation7], 0 }
   0x2   :  { %13 = vsyncpa [#allocation10], 0 }
   0x3   :  { %14 = vsyncpa [#allocation5], 0  ;;  %s1312_s21 = smov [#allocation6]   ;;  %s1313_s23 = smov [#allocation3]  }
   0x4   :  { %s32_s22 = sshll.u32 %s1312_s21, 4  ;;  %s20_s24 = sshll.u32 %s1313_s23, 4  ;;  %s33_s22 = int_to_ptr.vmem [resolvable:$true] %s32_s22  ;;  %s1354_s24 = int_to_ptr.vmem [resolvable:$true] %s20_s24 }
   0x5   :  { %s1194_s27 = scalar_lea.hbm %s1450_s1, 1024 }
   0x6   :  { %p1195_p0 = scmp.ne.s32.totalorder %s1450_s1, %s1194_s27  ;;  %p1198_p1 = scmp.lt.u32.totalorder %s1194_s27, %s1450_s1 }
   0x8   :  { %p1200_p2 = pnand %p1198_p1, %p1195_p0 }
   0xa   :  { %1203 = shalt.err (!%p1200_p2)
}
   0xb   :  { %s1204_s8 = scalar_lea.vmem %s33_s22, 1024  ;;  %p1209_p4 = scmp.lt.s32.totalorder %s33_s22, %s33_s22 }
   0xc   :  { %p1205_p3 = scmp.ne.s32.totalorder %s33_s22, %s1204_s8  ;;  %p1210_p5 = scmp.lt.s32.totalorder %s1204_s8, %s1204_s8 }
   0xe   :  { %p1211_p6 = por %p1210_p5, %p1209_p4 }
  0x10   :  { %p1212_p7 = pnand %p1211_p6, %p1205_p3 }
  0x12   :  { %1215 = shalt.err (!%p1212_p7)
}
  0x13   :  { %s1314_s9 = smov 64   ;;  %s1315_s10 = smov 4  }
  0x14   :  { %38 = dma.hbm_to_vmem [thread:$0]  %s1450_s1, 1024, %s33_s22, [#allocation7], %s1314_s9, %s1314_s9, %s1315_s10  }
  0x15   :  { %s1216_s15 = scalar_lea.hbm %s1449_s0, 1024 }
  0x16   :  { %p1217_p8 = scmp.ne.s32.totalorder %s1449_s0, %s1216_s15  ;;  %p1220_p9 = scmp.lt.u32.totalorder %s1216_s15, %s1449_s0 }
  0x18   :  { %p1222_p10 = pnand %p1220_p9, %p1217_p8 }
  0x1a   :  { %1225 = shalt.err (!%p1222_p10)
}
  0x1b   :  { %s1226_s20 = scalar_lea.vmem %s1354_s24, 1024  ;;  %p1231_p12 = scmp.lt.s32.totalorder %s1354_s24, %s1354_s24 }
  0x1c   :  { %p1227_p11 = scmp.ne.s32.totalorder %s1354_s24, %s1226_s20  ;;  %p1232_p13 = scmp.lt.s32.totalorder %s1226_s20, %s1226_s20 }
  0x1e   :  { %p1233_p0 = por %p1232_p13, %p1231_p12 }
  0x20   :  { %p1234_p1 = pnand %p1233_p0, %p1227_p11 }
  0x22   :  { %1237 = shalt.err (!%p1234_p1)
}
  0x23   :  { %26 = dma.hbm_to_vmem [thread:$0]  %s1449_s0, 1024, %s1354_s24, [#allocation4], %s1314_s9, %s1314_s9, %s1315_s10  }
  0x24   :  { %s1316_s22 = smov [#allocation8]   ;;  %s1317_s25 = smov [#allocation9]  }
  0x25   :  { %s44_s23 = sshll.u32 %s1316_s22, 4  ;;  %s58_s26 = sshll.u32 %s1317_s25, 4  ;;  %s45_s23 = int_to_ptr.vmem [resolvable:$true] %s44_s23  ;;  %s1391_s26 = int_to_ptr.vmem [resolvable:$true] %s58_s26 }
  0x26   :  { %s1238_s29 = scalar_lea.hbm %s1451_s2, 1024 }
  0x27   :  { %p1239_p2 = scmp.ne.s32.totalorder %s1451_s2, %s1238_s29  ;;  %p1242_p3 = scmp.lt.u32.totalorder %s1238_s29, %s1451_s2 }
  0x29   :  { %p1244_p4 = pnand %p1242_p3, %p1239_p2 }
  0x2b   :  { %1247 = shalt.err (!%p1244_p4)
}
  0x2c   :  { %s1248_s0 = scalar_lea.vmem %s45_s23, 1024  ;;  %p1253_p6 = scmp.lt.s32.totalorder %s45_s23, %s45_s23 }
  0x2d   :  { %p1249_p5 = scmp.ne.s32.totalorder %s45_s23, %s1248_s0  ;;  %p1254_p7 = scmp.lt.s32.totalorder %s1248_s0, %s1248_s0 }
  0x2f   :  { %p1255_p8 = por %p1254_p7, %p1253_p6 }
  0x31   :  { %p1256_p9 = pnand %p1255_p8, %p1249_p5 }
  0x33   :  { %1259 = shalt.err (!%p1256_p9)
}
  0x34   :  { %50 = dma.hbm_to_vmem [thread:$0]  %s1451_s2, 1024, %s45_s23, [#allocation7], %s1314_s9, %s1314_s9, %s1315_s10  }
  0x35   :  { %s1260_s15 = scalar_lea.hbm %s1453_s4, 1024 }
  0x36   :  { %p1261_p10 = scmp.ne.s32.totalorder %s1453_s4, %s1260_s15  ;;  %p1264_p11 = scmp.lt.u32.totalorder %s1260_s15, %s1453_s4 }
  0x38   :  { %p1266_p12 = pnand %p1264_p11, %p1261_p10 }
  0x3a   :  { %1269 = shalt.err (!%p1266_p12)
}
  0x3b   :  { %s1270_s20 = scalar_lea.vmem %s1391_s26, 1024  ;;  %p1275_p0 = scmp.lt.s32.totalorder %s1391_s26, %s1391_s26 }
  0x3c   :  { %p1271_p13 = scmp.ne.s32.totalorder %s1391_s26, %s1270_s20  ;;  %p1276_p1 = scmp.lt.s32.totalorder %s1270_s20, %s1270_s20 }
  0x3e   :  { %p1277_p2 = por %p1276_p1, %p1275_p0 }
  0x40   :  { %p1278_p3 = pnand %p1277_p2, %p1271_p13 }
  0x42   :  { %1281 = shalt.err (!%p1278_p3)
}
  0x43   :  { %64 = dma.hbm_to_vmem [thread:$0]  %s1453_s4, 1024, %s1391_s26, [#allocation10], %s1314_s9, %s1314_s9, %s1315_s10  }
  0x44   :  { %1304 = dma.done.wait [#allocation4], 1024  }
  0x45   :  { %1305 = vsyncadd [#allocation4], 4294966272 }
  0x46   :  { %1306 = dma.done.wait [#allocation7], 2048  }
  0x47   :  { %1307 = vsyncadd [#allocation7], 4294965248 }
  0x48   :  { %1308 = dma.done.wait [#allocation10], 1024  }
  0x49   :  { %1309 = vsyncadd [#allocation10], 4294966272  ;;  %v1162_v0 = vld [vmem:[#allocation6] sm:$0xff]   ;;  %v1163_v1 = vld [vmem:[#allocation6 + $0x8] sm:$0xff]  }
  0x4a   :  { %1043 = vmatprep.subr.bf16.mxu0 %v1162_v0  ;;  %v1164_v2 = vld [vmem:[#allocation6 + $0x10] sm:$0xff]   ;;  %v1165_v3 = vld [vmem:[#allocation6 + $0x18] sm:$0xff]   ;;  %v1170_v4 = vld [vmem:[#allocation3] sm:$0xff]  }
  0x4b   :  { %1044 = vmatpush3.bf16.msra.mxu0 %v1162_v0  ;;  %1059 = vmatprep.mubr.bf16.mxu0 %v1170_v4  ;;  %v1166_v5 = vld [vmem:[#allocation6 + $0x20] sm:$0xff]   ;;  %v1167_v6 = vld [vmem:[#allocation6 + $0x28] sm:$0xff]   ;;  %v1168_v9 = vld [vmem:[#allocation6 + $0x30] sm:$0xff]  }
  0x4c   :  { %1045 = vmatprep.subr.bf16.mxu0 %v1163_v1  ;;  %v1178_v7 = vld [vmem:[#allocation8] sm:$0xff]   ;;  %v1179_v8 = vld [vmem:[#allocation8 + $0x8] sm:$0xff]   ;;  %v1180_v10 = vld [vmem:[#allocation8 + $0x10] sm:$0xff]  }
  0x4d   :  { %1075 = vmatprep.subr.bf16.mxu1 %v1178_v7  ;;  %v1169_v11 = vld [vmem:[#allocation6 + $0x38] sm:$0xff]   ;;  %v1182_v13 = vld [vmem:[#allocation8 + $0x20] sm:$0xff]   ;;  %v1171_v14 = vld [vmem:[#allocation3 + $0x8] sm:$0xff]  }
  0x4e   :  { %1076 = vmatpush3.bf16.msra.mxu1 %v1178_v7  ;;  %v1181_v12 = vld [vmem:[#allocation8 + $0x18] sm:$0xff]   ;;  %v1172_v15 = vld [vmem:[#allocation3 + $0x10] sm:$0xff]   ;;  %v1183_v16 = vld [vmem:[#allocation8 + $0x28] sm:$0xff]  }
  0x4f   :  { %1046 = vmatpush3.bf16.msra.mxu0 %v1163_v1  ;;  %1077 = vmatprep.subr.bf16.mxu1 %v1179_v8  ;;  %v1184_v17 = vld [vmem:[#allocation8 + $0x30] sm:$0xff]   ;;  %v1173_v18 = vld [vmem:[#allocation3 + $0x18] sm:$0xff]   ;;  %v1174_v19 = vld [vmem:[#allocation3 + $0x20] sm:$0xff]  }
  0x50   :  { %1047 = vmatprep.subr.bf16.mxu0 %v1164_v2  ;;  %v1175_v20 = vld [vmem:[#allocation3 + $0x28] sm:$0xff]   ;;  %v1176_v21 = vld [vmem:[#allocation3 + $0x30] sm:$0xff]   ;;  %v1177_v22 = vld [vmem:[#allocation3 + $0x38] sm:$0xff]  }
  0x51   :  { %v1185_v23 = vld [vmem:[#allocation8 + $0x38] sm:$0xff]   ;;  %v1186_v24 = vld [vmem:[#allocation9] sm:$0xff]   ;;  %v1187_v25 = vld [vmem:[#allocation9 + $0x8] sm:$0xff]  }
  0x52   :  { %1078 = vmatpush3.bf16.msra.mxu1 %v1179_v8  ;;  %v1188_v26 = vld [vmem:[#allocation9 + $0x10] sm:$0xff]   ;;  %v1189_v27 = vld [vmem:[#allocation9 + $0x18] sm:$0xff]   ;;  %v1190_v28 = vld [vmem:[#allocation9 + $0x20] sm:$0xff]  }
  0x53   :  { %1048 = vmatpush3.bf16.msra.mxu0 %v1164_v2  ;;  %1079 = vmatprep.subr.bf16.mxu1 %v1180_v10  ;;  %v1191_v29 = vld [vmem:[#allocation9 + $0x28] sm:$0xff]   ;;  %v1192_v54 = vld [vmem:[#allocation9 + $0x30] sm:$0xff]   ;;  %v1193_v55 = vld [vmem:[#allocation9 + $0x38] sm:$0xff]  }
  0x54   :  { %1049 = vmatprep.subr.bf16.mxu0 %v1165_v3  ;;  %v898_v56 = vld [vmem:[%s1452_s3] ss:$0 sm:$0xff] }
  0x56   :  { %1080 = vmatpush3.bf16.msra.mxu1 %v1180_v10 }
  0x57   :  { %1050 = vmatpush3.bf16.msra.mxu0 %v1165_v3  ;;  %1081 = vmatprep.subr.bf16.mxu1 %v1181_v12 }
  0x58   :  { %1051 = vmatprep.subr.bf16.mxu0 %v1166_v5 }
  0x5a   :  { %1082 = vmatpush3.bf16.msra.mxu1 %v1181_v12 }
  0x5b   :  { %1052 = vmatpush3.bf16.msra.mxu0 %v1166_v5  ;;  %1083 = vmatprep.subr.bf16.mxu1 %v1182_v13 }
  0x5c   :  { %1053 = vmatprep.subr.bf16.mxu0 %v1167_v6 }
  0x5e   :  { %1084 = vmatpush3.bf16.msra.mxu1 %v1182_v13 }
  0x5f   :  { %1054 = vmatpush3.bf16.msra.mxu0 %v1167_v6  ;;  %1085 = vmatprep.subr.bf16.mxu1 %v1183_v16 }
  0x60   :  { %1055 = vmatprep.subr.bf16.mxu0 %v1168_v9 }
  0x62   :  { %1086 = vmatpush3.bf16.msra.mxu1 %v1183_v16 }
  0x63   :  { %1056 = vmatpush3.bf16.msra.mxu0 %v1168_v9  ;;  %1087 = vmatprep.subr.bf16.mxu1 %v1184_v17 }
  0x64   :  { %1057 = vmatprep.subr.bf16.mxu0 %v1169_v11 }
  0x66   :  { %1088 = vmatpush3.bf16.msra.mxu1 %v1184_v17 }
  0x67   :  { %1058 = vmatpush3.bf16.msra.mxu0 %v1169_v11  ;;  %1089 = vmatprep.subr.bf16.mxu1 %v1185_v23 }
  0x68   :  { %1107 = vmatprep.subr.bf16.mxu0 %v1186_v24 }
  0x6a   :  { %1060 = vmatmul.mubr.bf16.vlgmr.msra.gmra.mrb[0].mxu0 %v1171_v14  ;;  %1090 = vmatpush3.bf16.msra.mxu1 %v1185_v23 }
  0x6b   :  { %1063 = vmatprep.mubr.bf16.mxu0 %v1172_v15  ;;  %1139 = vmatprep.subr.bf16.mxu1 %v1186_v24 }
  0x6c   :  { %1108 = vmatpush3.bf16.msra.mxu0 %v1186_v24 }
  0x6d   :  { %1109 = vmatprep.subr.bf16.mxu0 %v1187_v25 }
  0x70   :  { %1110 = vmatpush3.bf16.msra.mxu0 %v1187_v25 }
  0x71   :  { %1111 = vmatprep.subr.bf16.mxu0 %v1188_v26 }
  0x72   :  { %1064 = vmatmul.mubr.bf16.gmra.mrb[4].mxu0 %v1173_v18 }
  0x73   :  { %1067 = vmatprep.mubr.bf16.mxu0 %v1174_v19 }
  0x74   :  { %1112 = vmatpush3.bf16.msra.mxu0 %v1188_v26 }
  0x75   :  { %1113 = vmatprep.subr.bf16.mxu0 %v1189_v27 }
  0x78   :  { %1114 = vmatpush3.bf16.msra.mxu0 %v1189_v27 }
  0x79   :  { %1115 = vmatprep.subr.bf16.mxu0 %v1190_v28 }
  0x7a   :  { %1068 = vmatmul.mubr.bf16.gmra.mrb[8].mxu0 %v1175_v20 }
  0x7b   :  { %1071 = vmatprep.mubr.bf16.mxu0 %v1176_v21 }
  0x7c   :  { %1116 = vmatpush3.bf16.msra.mxu0 %v1190_v28 }
  0x7d   :  { %1117 = vmatprep.subr.bf16.mxu0 %v1191_v29 }
  0x80   :  { %1118 = vmatpush3.bf16.msra.mxu0 %v1191_v29 }
  0x81   :  { %1119 = vmatprep.subr.bf16.mxu0 %v1192_v54 }
  0x82   :  { %1072 = vmatmul.mubr.bf16.gmra.mrb[12].mxu0 %v1177_v22 }
  0x84   :  { %1120 = vmatpush3.bf16.msra.mxu0 %v1192_v54 }
  0x85   :  { %1121 = vmatprep.subr.bf16.mxu0 %v1193_v55 }
  0x88   :  { %1122 = vmatpush3.bf16.msra.mxu0 %v1193_v55 }
 0x13d   :  { %v1061_v30 = vpop.f32.mrb[0].mxu0 }
 0x13e   :  { %v283_v31 = vpop.f32.mrb[1].mxu0 }
 0x13f   :  { %v1062_v32 = vpop.f32.mrb[2].mxu0 }
 0x140   :  { %v398_v33 = vpack.c.bf16 %v1062_v32, %v1061_v30  ;;  %v286_v34 = vpop.f32.mrb[3].mxu0 }
 0x141   :  { %v397_v35 = vpack.c.bf16 %v286_v34, %v283_v31 }
 0x143   :  { %1091 = vmatprep.mubr.bf16.mxu1 %v397_v35 }
 0x144   :  { %1092 = vmatmul.mubr.bf16.vlgmr.msra.gmra.mrb[0].mxu1 %v398_v33 }
 0x145   :  { %v1065_v36 = vpop.f32.mrb[4].mxu0  ;;  %1147 = vmatpush3.bf16.msra.mxu1 %v1186_v24 }
 0x146   :  { %v299_v37 = vpop.f32.mrb[5].mxu0  ;;  %1140 = vmatprep.subr.bf16.mxu1 %v1187_v25 }
 0x147   :  { %v1066_v38 = vpop.f32.mrb[6].mxu0 }
 0x148   :  { %v400_v39 = vpack.c.bf16 %v1066_v38, %v1065_v36  ;;  %v302_v40 = vpop.f32.mrb[7].mxu0 }
 0x149   :  { %v399_v41 = vpack.c.bf16 %v302_v40, %v299_v37  ;;  %1148 = vmatpush3.bf16.msra.mxu1 %v1187_v25 }
 0x14a   :  { %1141 = vmatprep.subr.bf16.mxu1 %v1188_v26 }
 0x14b   :  { %1095 = vmatprep.mubr.bf16.mxu1 %v399_v41 }
 0x14c   :  { %1096 = vmatmul.mubr.bf16.gmra.mrb[4].mxu1 %v400_v39 }
 0x14d   :  { %v1069_v42 = vpop.f32.mrb[8].mxu0  ;;  %1149 = vmatpush3.bf16.msra.mxu1 %v1188_v26 }
 0x14e   :  { %v315_v43 = vpop.f32.mrb[9].mxu0  ;;  %1142 = vmatprep.subr.bf16.mxu1 %v1189_v27 }
 0x14f   :  { %v1070_v44 = vpop.f32.mrb[10].mxu0 }
 0x150   :  { %v402_v45 = vpack.c.bf16 %v1070_v44, %v1069_v42  ;;  %v318_v46 = vpop.f32.mrb[11].mxu0 }
 0x151   :  { %v401_v47 = vpack.c.bf16 %v318_v46, %v315_v43  ;;  %1150 = vmatpush3.bf16.msra.mxu1 %v1189_v27 }
 0x152   :  { %1143 = vmatprep.subr.bf16.mxu1 %v1190_v28 }
 0x153   :  { %1099 = vmatprep.mubr.bf16.mxu1 %v401_v47 }
 0x154   :  { %1100 = vmatmul.mubr.bf16.gmra.mrb[8].mxu1 %v402_v45 }
 0x155   :  { %v1073_v48 = vpop.f32.mrb[12].mxu0  ;;  %1151 = vmatpush3.bf16.msra.mxu1 %v1190_v28 }
 0x156   :  { %v331_v49 = vpop.f32.mrb[13].mxu0  ;;  %1144 = vmatprep.subr.bf16.mxu1 %v1191_v29 }
 0x157   :  { %v1074_v50 = vpop.f32.mrb[14].mxu0 }
 0x158   :  { %v404_v51 = vpack.c.bf16 %v1074_v50, %v1073_v48  ;;  %v334_v52 = vpop.f32.mrb[15].mxu0 }
 0x159   :  { %v403_v53 = vpack.c.bf16 %v334_v52, %v331_v49  ;;  %1152 = vmatpush3.bf16.msra.mxu1 %v1191_v29  ;;  %v907_v49 = vld [vmem:[%s1454_s5] ss:$0 sm:$0xff]  ;;  %s1318_s5 = smov [#allocation11]  }
 0x15a   :  { %1145 = vmatprep.subr.bf16.mxu1 %v1192_v54  ;;  %s866_s23 = sshll.u32 %s1318_s5, 4  ;;  %s867_s23 = int_to_ptr.vmem [resolvable:$true] %s866_s23 }
 0x15b   :  { %1103 = vmatprep.mubr.bf16.mxu1 %v403_v53  ;;  %s1282_s25 = scalar_lea.vmem %s867_s23, 1024  ;;  %p1287_p5 = scmp.lt.s32.totalorder %s867_s23, %s867_s23 }
 0x15c   :  { %1104 = vmatmul.mubr.bf16.gmra.mrb[12].mxu1 %v404_v51  ;;  %p1283_p4 = scmp.ne.s32.totalorder %s867_s23, %s1282_s25  ;;  %p1288_p6 = scmp.lt.s32.totalorder %s1282_s25, %s1282_s25 }
 0x15d   :  { %1153 = vmatpush3.bf16.msra.mxu1 %v1192_v54 }
 0x15e   :  { %1146 = vmatprep.subr.bf16.mxu1 %v1193_v55  ;;  %p1289_p7 = por %p1288_p6, %p1287_p5 }
 0x160   :  { %p1290_p8 = pnand %p1289_p7, %p1283_p4 }
 0x161   :  { %1154 = vmatpush3.bf16.msra.mxu1 %v1193_v55 }
 0x217   :  { %v1093_v57 = vpop.f32.mrb[0].mxu1 }
 0x218   :  { %v519_v58 = vadd.f32 %v1093_v57, %v898_v56  ;;  %v510_v59 = vpop.f32.mrb[1].mxu1 }
 0x219   :  { %v511_v60 = vadd.f32 %v898_v56, %v510_v59  ;;  %v1094_v61 = vpop.f32.mrb[2].mxu1 }
 0x21a   :  { %v522_v62 = vadd.f32 %v1094_v61, %v898_v56  ;;  %v513_v63 = vpop.f32.mrb[3].mxu1  ;;  %v575_v1 = vmax.f32 %v519_v58, 0.0 }
 0x21b   :  { %v514_v0 = vadd.f32 %v898_v56, %v513_v63  ;;  %v573_v3 = vmax.f32 %v511_v60, 0.0 }
 0x21c   :  { %v576_v2 = vmax.f32 %v522_v62, 0.0 }
 0x21d   :  { %v574_v4 = vmax.f32 %v514_v0, 0.0 }
 0x21e   :  { %v590_v5 = vpack.c.bf16 %v576_v2, %v575_v1 }
 0x21f   :  { %v589_v6 = vpack.c.bf16 %v574_v4, %v573_v3  ;;  %v1097_v7 = vpop.f32.mrb[4].mxu1 }
 0x220   :  { %v535_v8 = vadd.f32 %v1097_v7, %v898_v56  ;;  %v526_v9 = vpop.f32.mrb[5].mxu1 }
 0x221   :  { %v527_v10 = vadd.f32 %v898_v56, %v526_v9  ;;  %v1098_v11 = vpop.f32.mrb[6].mxu1  ;;  %1123 = vmatprep.mubr.bf16.mxu0 %v589_v6 }
 0x222   :  { %v538_v12 = vadd.f32 %v1098_v11, %v898_v56  ;;  %v529_v13 = vpop.f32.mrb[7].mxu1  ;;  %1124 = vmatmul.mubr.bf16.vlgmr.msra.gmra.mrb[16].mxu0 %v590_v5  ;;  %v579_v15 = vmax.f32 %v535_v8, 0.0 }
 0x223   :  { %v530_v14 = vadd.f32 %v898_v56, %v529_v13  ;;  %v577_v17 = vmax.f32 %v527_v10, 0.0 }
 0x224   :  { %v580_v16 = vmax.f32 %v538_v12, 0.0 }
 0x225   :  { %v578_v18 = vmax.f32 %v530_v14, 0.0 }
 0x226   :  { %v592_v19 = vpack.c.bf16 %v580_v16, %v579_v15 }
 0x227   :  { %v591_v20 = vpack.c.bf16 %v578_v18, %v577_v17  ;;  %v1101_v21 = vpop.f32.mrb[8].mxu1 }
 0x228   :  { %v551_v22 = vadd.f32 %v1101_v21, %v898_v56  ;;  %v542_v23 = vpop.f32.mrb[9].mxu1 }
 0x229   :  { %v543_v24 = vadd.f32 %v898_v56, %v542_v23  ;;  %v1102_v25 = vpop.f32.mrb[10].mxu1  ;;  %1127 = vmatprep.mubr.bf16.mxu0 %v591_v20 }
 0x22a   :  { %v554_v26 = vadd.f32 %v1102_v25, %v898_v56  ;;  %v545_v27 = vpop.f32.mrb[11].mxu1  ;;  %1128 = vmatmul.mubr.bf16.gmra.mrb[20].mxu0 %v592_v19  ;;  %v583_v29 = vmax.f32 %v551_v22, 0.0 }
 0x22b   :  { %v546_v28 = vadd.f32 %v898_v56, %v545_v27  ;;  %v581_v31 = vmax.f32 %v543_v24, 0.0 }
 0x22c   :  { %v584_v30 = vmax.f32 %v554_v26, 0.0 }
 0x22d   :  { %v582_v32 = vmax.f32 %v546_v28, 0.0 }
 0x22e   :  { %v594_v33 = vpack.c.bf16 %v584_v30, %v583_v29 }
 0x22f   :  { %v593_v34 = vpack.c.bf16 %v582_v32, %v581_v31  ;;  %v1105_v35 = vpop.f32.mrb[12].mxu1 }
 0x230   :  { %v567_v36 = vadd.f32 %v1105_v35, %v898_v56  ;;  %v558_v37 = vpop.f32.mrb[13].mxu1 }
 0x231   :  { %v559_v38 = vadd.f32 %v898_v56, %v558_v37  ;;  %v1106_v39 = vpop.f32.mrb[14].mxu1  ;;  %1131 = vmatprep.mubr.bf16.mxu1 %v593_v34 }
 0x232   :  { %v570_v40 = vadd.f32 %v1106_v39, %v898_v56  ;;  %v561_v41 = vpop.f32.mrb[15].mxu1  ;;  %1132 = vmatmul.mubr.bf16.vlgmr.msra.gmra.mrb[16].mxu1 %v594_v33  ;;  %v587_v43 = vmax.f32 %v567_v36, 0.0 }
 0x233   :  { %v562_v42 = vadd.f32 %v898_v56, %v561_v41  ;;  %v585_v45 = vmax.f32 %v559_v38, 0.0 }
 0x234   :  { %v588_v44 = vmax.f32 %v570_v40, 0.0 }
 0x235   :  { %v586_v46 = vmax.f32 %v562_v42, 0.0 }
 0x236   :  { %v596_v47 = vpack.c.bf16 %v588_v44, %v587_v43 }
 0x237   :  { %v595_v48 = vpack.c.bf16 %v586_v46, %v585_v45 }
 0x239   :  { %1135 = vmatprep.mubr.bf16.mxu1 %v595_v48 }
 0x23a   :  { %1136 = vmatmul.mubr.bf16.gmra.mrb[20].mxu1 %v596_v47 }
 0x2f5   :  { %v1125_v50 = vpop.f32.mrb[16].mxu0 }
 0x2f6   :  { %v711_v51 = vadd.f32 %v1125_v50, %v907_v49  ;;  %v702_v52 = vpop.f32.mrb[17].mxu0 }
 0x2f7   :  { %v703_v53 = vadd.f32 %v907_v49, %v702_v52  ;;  %v1126_v54 = vpop.f32.mrb[18].mxu0 }
 0x2f8   :  { %v714_v55 = vadd.f32 %v1126_v54, %v907_v49  ;;  %v705_v57 = vpop.f32.mrb[19].mxu0  ;;  %v767_v58 = vmax.f32 %v711_v51, 0.0 }
 0x2f9   :  { %v706_v56 = vadd.f32 %v907_v49, %v705_v57  ;;  %v765_v60 = vmax.f32 %v703_v53, 0.0 }
 0x2fa   :  { %v768_v59 = vmax.f32 %v714_v55, 0.0 }
 0x2fb   :  { %v766_v61 = vmax.f32 %v706_v56, 0.0 }
 0x2fc   :  { %v956_v62 = vpack.c.bf16 %v768_v59, %v767_v58 }
 0x2fd   :  { %v951_v63 = vpack.c.bf16 %v766_v61, %v765_v60  ;;  %v1129_v0 = vpop.f32.mrb[20].mxu0 }
 0x2fe   :  { %988 = vst [vmem:[#allocation11 + $0x8] sm:$0xff] %v956_v62   ;;  %v727_v1 = vadd.f32 %v1129_v0, %v907_v49  ;;  %v718_v2 = vpop.f32.mrb[21].mxu0 }
 0x2ff   :  { %952 = vst [vmem:[#allocation11] sm:$0xff] %v951_v63   ;;  %v719_v3 = vadd.f32 %v907_v49, %v718_v2  ;;  %v1130_v4 = vpop.f32.mrb[22].mxu0 }
 0x300   :  { %v730_v5 = vadd.f32 %v1130_v4, %v907_v49  ;;  %v721_v6 = vpop.f32.mrb[23].mxu0  ;;  %v771_v8 = vmax.f32 %v727_v1, 0.0 }
 0x301   :  { %v722_v7 = vadd.f32 %v907_v49, %v721_v6  ;;  %v769_v10 = vmax.f32 %v719_v3, 0.0 }
 0x302   :  { %v772_v9 = vmax.f32 %v730_v5, 0.0 }
 0x303   :  { %v770_v11 = vmax.f32 %v722_v7, 0.0 }
 0x304   :  { %v966_v12 = vpack.c.bf16 %v772_v9, %v771_v8 }
 0x305   :  { %v961_v13 = vpack.c.bf16 %v770_v11, %v769_v10  ;;  %v1133_v14 = vpop.f32.mrb[16].mxu1 }
 0x306   :  { %990 = vst [vmem:[#allocation11 + $0x18] sm:$0xff] %v966_v12   ;;  %v743_v15 = vadd.f32 %v1133_v14, %v907_v49  ;;  %v734_v16 = vpop.f32.mrb[17].mxu1 }
 0x307   :  { %989 = vst [vmem:[#allocation11 + $0x10] sm:$0xff] %v961_v13   ;;  %v735_v17 = vadd.f32 %v907_v49, %v734_v16  ;;  %v1134_v18 = vpop.f32.mrb[18].mxu1 }
 0x308   :  { %v746_v19 = vadd.f32 %v1134_v18, %v907_v49  ;;  %v737_v20 = vpop.f32.mrb[19].mxu1  ;;  %v775_v22 = vmax.f32 %v743_v15, 0.0 }
 0x309   :  { %v738_v21 = vadd.f32 %v907_v49, %v737_v20  ;;  %v773_v24 = vmax.f32 %v735_v17, 0.0 }
 0x30a   :  { %v776_v23 = vmax.f32 %v746_v19, 0.0 }
 0x30b   :  { %v774_v25 = vmax.f32 %v738_v21, 0.0 }
 0x30c   :  { %v976_v26 = vpack.c.bf16 %v776_v23, %v775_v22 }
 0x30d   :  { %v971_v27 = vpack.c.bf16 %v774_v25, %v773_v24  ;;  %v1137_v28 = vpop.f32.mrb[20].mxu1 }
 0x30e   :  { %992 = vst [vmem:[#allocation11 + $0x28] sm:$0xff] %v976_v26   ;;  %v759_v29 = vadd.f32 %v1137_v28, %v907_v49  ;;  %v750_v30 = vpop.f32.mrb[21].mxu1 }
 0x30f   :  { %991 = vst [vmem:[#allocation11 + $0x20] sm:$0xff] %v971_v27   ;;  %v751_v31 = vadd.f32 %v907_v49, %v750_v30  ;;  %v1138_v32 = vpop.f32.mrb[22].mxu1 }
 0x310   :  { %v762_v33 = vadd.f32 %v1138_v32, %v907_v49  ;;  %v753_v34 = vpop.f32.mrb[23].mxu1  ;;  %v779_v36 = vmax.f32 %v759_v29, 0.0 }
 0x311   :  { %v754_v35 = vadd.f32 %v907_v49, %v753_v34  ;;  %v777_v38 = vmax.f32 %v751_v31, 0.0 }
 0x312   :  { %v780_v37 = vmax.f32 %v762_v33, 0.0 }
 0x313   :  { %v778_v39 = vmax.f32 %v754_v35, 0.0 }
 0x314   :  { %v986_v40 = vpack.c.bf16 %v780_v37, %v779_v36 }
 0x315   :  { %v981_v41 = vpack.c.bf16 %v778_v39, %v777_v38 }
 0x316   :  { %994 = vst [vmem:[#allocation11 + $0x38] sm:$0xff] %v986_v40  }
 0x317   :  { %993 = vst [vmem:[#allocation11 + $0x30] sm:$0xff] %v981_v41  }
 0x318   :  { %1293 = shalt.err (!%p1290_p8)
}
 0x319   :  { %s1294_s28 = scalar_lea.hbm %s1455_s6, 1024 }
 0x31a   :  { %p1295_p9 = scmp.ne.s32.totalorder %s1455_s6, %s1294_s28  ;;  %p1298_p10 = scmp.lt.u32.totalorder %s1294_s28, %s1455_s6 }
 0x31c   :  { %p1300_p11 = pnand %p1298_p10, %p1295_p9 }
 0x31e   :  { %1303 = shalt.err (!%p1300_p11)
}
 0x31f   :  { %872 = dma.vmem_to_hbm [thread:$0]  %s867_s23, 1024, %s1455_s6, [#allocation5], %s1314_s9, %s1314_s9, %s1315_s10  }
 0x320   :  { %1310 = dma.done.wait [#allocation5], 1024  }
 0x321   :  { %1311 = vsyncadd [#allocation5], 4294966272 }
 0x322   :  { %876 = vsyncpa [#allocation4], 1 }
 0x323   :  { %877 = vsyncpa [#allocation7], 1 }
 0x324   :  { %878 = vsyncpa [#allocation10], 1 }
 0x325   :  { %879 = vsyncpa [#allocation5], 1 }

</bundles_post_ra>
